<compile_context>
chip_gen: v7x
topology: tpu7x:2x2x1
jax: 0.10.0
libtpu: 0.0.40
codegen_flags: <defaults>
</compile_context>

<pallas_src>
import functools

import jax
import jax.numpy as jnp
from jax.experimental import pallas as pl
from jax.experimental.pallas import tpu as pltpu


def _ffn_ln_kernel(x_ref, w1t_ref, b1_ref, w2t_ref, b2_ref, g_ref, beta_ref,
                   out_ref, *, eps):
    # x tile: (TR, C).  Read once; bf16 copy feeds the MXU, f32 copy feeds the
    # residual / LayerNorm path (no redundant f32->bf16 round trip).
    x = x_ref[...]
    x_f32 = x.astype(jnp.float32)

    # expand: (TR, C) @ (C, 2C) + b1   -- bf16 MXU operands, f32 accumulation.
    h = jnp.dot(x.astype(jnp.bfloat16), w1t_ref[...],
                preferred_element_type=jnp.float32) + b1_ref[...]
    # ReLU (f32 VPU).
    h = jnp.maximum(h, 0.0)

    # squeeze: (TR, 2C) @ (2C, C) + b2
    y = jnp.dot(h.astype(jnp.bfloat16), w2t_ref[...],
                preferred_element_type=jnp.float32) + b2_ref[...]

    # dropout=None -> identity.  Residual in f32 keeps the dominant signal exact.
    r = x_f32 + y

    # LayerNorm over the channel dim (eps = 1e-5, PyTorch default).
    mean = jnp.mean(r, axis=-1, keepdims=True)
    ctr = r - mean
    var = jnp.mean(ctr * ctr, axis=-1, keepdims=True)
    inv = jax.lax.rsqrt(var + eps)                      # EUP slot
    out = ctr * inv * g_ref[...] + beta_ref[...]

    out_ref[...] = out.astype(out_ref.dtype)


def _round_up(x, m):
    return ((x + m - 1) // m) * m


def _cdiv(a, b):
    return -(-a // b)


def _vmem_capacity_bytes():
    try:
        return int(pltpu.get_tpu_info().vmem_capacity_bytes)
    except Exception:
        return 64 * 1024 * 1024   # conservative: v7x per-TC VMEM


def _pick_row_tile(rows, C, x_bytes, out_bytes, vmem_budget):
    """Largest balanced row tile (multiple of 8, <=512) that fits the budget."""
    # Resident, single-buffered weights: W1.T + W2.T in bf16 = 8*C*C bytes
    # (+ tiny biases / gamma / beta).
    weight_bytes = 8 * C * C + 8 * 4 * C
    # Per-row VMEM footprint: double-buffered x and out tiles plus the f32
    # hidden (8C), its bf16 copy (4C), the bf16 x copy (2C) and ~4 f32
    # (TR, C) working values for the residual / LayerNorm (16C).
    per_row = 2 * C * x_bytes + 2 * C * out_bytes + C * (8 + 4 + 2 + 16)
    avail = vmem_budget - weight_bytes - (4 << 20)      # 4 MiB slack
    max_rows = max(8, (avail // per_row) // 8 * 8)
    target = min(512, max_rows)
    if rows <= target:
        return _round_up(rows, 8)
    steps = _cdiv(rows, target)
    tile = min(_round_up(_cdiv(rows, steps), 8), max_rows)
    return tile


def attention_output(input_states, params, *, eps=1e-5, row_tile=None,
                     io_dtype=None):
    """Pallas implementation of AttentionOutput.forward (dropout=None, ReLU)."""
    B, N, C = input_states.shape
    rows = B * N
    x2d = input_states.reshape(rows, C)

    # Optional bf16 activation streaming (halves HBM traffic for this
    # HBM-bound op).  Default: keep caller's dtype.
    if io_dtype is not None:
        x2d = x2d.astype(io_dtype)
    in_dtype = x2d.dtype
    out_dtype = in_dtype
    x_bytes = jnp.dtype(in_dtype).itemsize
    out_bytes = jnp.dtype(out_dtype).itemsize

    # Pre-transpose + pre-cast weights once in the wrapper (no in-kernel W.T).
    w1t = jnp.asarray(params["w1"]).T.astype(jnp.bfloat16)      # (C, 2C)
    b1 = jnp.asarray(params["b1"]).reshape(1, 2 * C).astype(jnp.float32)
    w2t = jnp.asarray(params["w2"]).T.astype(jnp.bfloat16)      # (2C, C)
    b2 = jnp.asarray(params["b2"]).reshape(1, C).astype(jnp.float32)
    gamma = jnp.asarray(params["gamma"]).reshape(1, C).astype(jnp.float32)
    beta = jnp.asarray(params["beta"]).reshape(1, C).astype(jnp.float32)

    # Per-generation VMEM budget: 48 MiB on 64 MiB chips (v7x), 100 MiB on
    # 128 MiB chips (v5e / v6e).
    vmem_cap = _vmem_capacity_bytes()
    vmem_limit = (48 << 20) if vmem_cap <= (64 << 20) else (100 << 20)

    if row_tile is None:
        row_tile = _pick_row_tile(rows, C, x_bytes, out_bytes, vmem_limit)
    row_tile = _round_up(int(row_tile), 8)

    # Rows are independent (per-row FFN + LayerNorm): pad instead of requiring
    # divisibility, then slice the padding off afterwards.
    padded_rows = _round_up(rows, row_tile)
    if padded_rows != rows:
        x2d = jnp.pad(x2d, ((0, padded_rows - rows), (0, 0)))
    grid = (padded_rows // row_tile,)

    kernel = functools.partial(_ffn_ln_kernel, eps=eps)

    # Advisory cost hint so XLA schedules the wrapper-side casts/reshapes well.
    cost = pl.CostEstimate(
        flops=8 * rows * C * C,                         # expand + squeeze GEMMs
        transcendentals=rows,                           # rsqrt per row
        bytes_accessed=rows * C * (x_bytes + out_bytes) + 8 * C * C,
    )

    vmem_space = pltpu.MemorySpace.VMEM
    out2d = pl.pallas_call(
        kernel,
        out_shape=jax.ShapeDtypeStruct((padded_rows, C), out_dtype),
        grid_spec=pltpu.PrefetchScalarGridSpec(
            num_scalar_prefetch=0,
            grid=grid,
            in_specs=[
                pl.BlockSpec((row_tile, C), lambda i: (i, 0)),       # x tile
                pl.BlockSpec(memory_space=vmem_space),               # W1.T (bf16, resident)
                pl.BlockSpec(memory_space=vmem_space),               # b1
                pl.BlockSpec(memory_space=vmem_space),               # W2.T (bf16, resident)
                pl.BlockSpec(memory_space=vmem_space),               # b2
                pl.BlockSpec(memory_space=vmem_space),               # gamma
                pl.BlockSpec(memory_space=vmem_space),               # beta
            ],
            out_specs=pl.BlockSpec((row_tile, C), lambda i: (i, 0)),
        ),
        compiler_params=pltpu.CompilerParams(
            dimension_semantics=("parallel",),
            vmem_limit_bytes=vmem_limit,
        ),
        cost_estimate=cost,
    )(x2d, w1t, b1, w2t, b2, gamma, beta)

    out2d = out2d[:rows]
    return out2d.reshape(B, N, C).astype(input_states.dtype)


def _reference(input_states, params, eps=1e-5):
    """Plain-JAX f32 reference mirroring the PyTorch forward."""
    x = input_states
    h = x @ params["w1"].T + params["b1"]
    h = jnp.maximum(h, 0.0)
    h = h @ params["w2"].T + params["b2"]
    r = x + h
    mean = r.mean(axis=-1, keepdims=True)
    var = ((r - mean) ** 2).mean(axis=-1, keepdims=True)
    return (r - mean) / jnp.sqrt(var + eps) * params["gamma"] + params["beta"]


if __name__ == "__main__":
    # Small shapes consistent with the module: batch=2, seq=64, d_model=128.
    B, N, C = 2, 64, 128
    H = 2 * C  # expanded hidden width

    key = jax.random.PRNGKey(0)
    ks = jax.random.split(key, 7)
    input_states = jax.random.normal(ks[0], (B, N, C), jnp.float32)

    s1 = 1.0 / (C ** 0.5)
    s2 = 1.0 / (H ** 0.5)
    params = {
        "w1": jax.random.uniform(ks[1], (H, C), jnp.float32, -s1, s1),   # expand
        "b1": jax.random.uniform(ks[2], (H,), jnp.float32, -s1, s1),
        "b2": jax.random.uniform(ks[4], (C,), jnp.float32, -s2, s2),
        "w2": jax.random.uniform(ks[3], (C, H), jnp.float32, -s2, s2),   # squeeze
        "gamma": 1.0 + 0.1 * jax.random.uniform(ks[5], (C,), jnp.float32, -1.0, 1.0),
        "beta": 0.1 * jax.random.uniform(ks[6], (C,), jnp.float32, -1.0, 1.0),
    }

    out = attention_output(input_states, params)
    jax.block_until_ready(out)

    ref = _reference(input_states, params)
    assert out.shape == (B, N, C)
    # bf16 MXU operands with f32 accumulation -> relaxed tolerance vs f32 reference.
    assert jnp.allclose(out, ref, atol=3e-2, rtol=3e-2), float(jnp.max(jnp.abs(out - ref)))

    print("KERNEL_OK")
</pallas_src>

<mosaic_0001>
module attributes {stable_mosaic.version = 11 : i64} {
  func.func @_ffn_ln_kernel(%arg0: i32, %arg1: memref<128x128xf32, #tpu.memory_space<vmem>>, %arg2: memref<128x256xbf16, #tpu.memory_space<vmem>>, %arg3: memref<1x256xf32, #tpu.memory_space<vmem>>, %arg4: memref<256x128xbf16, #tpu.memory_space<vmem>>, %arg5: memref<1x128xf32, #tpu.memory_space<vmem>>, %arg6: memref<1x128xf32, #tpu.memory_space<vmem>>, %arg7: memref<1x128xf32, #tpu.memory_space<vmem>>, %arg8: memref<128x128xf32, #tpu.memory_space<vmem>>) attributes {dimension_semantics = [#tpu.dimension_semantics<parallel>], iteration_bounds = array<i64: 1>, scalar_prefetch = 0 : i64, scratch_operands = 0 : i64, tpu.core_type = #tpu.core_type<tc>, window_params = [{transform_indices = @transform_0, window_bounds = array<i64: 128, 128>}, {pipeline_mode = #tpu.pipeline_mode<synchronous>, transform_indices = @transform_1, window_bounds = array<i64: 128, 256>}, {pipeline_mode = #tpu.pipeline_mode<synchronous>, transform_indices = @transform_2, window_bounds = array<i64: 1, 256>}, {pipeline_mode = #tpu.pipeline_mode<synchronous>, transform_indices = @transform_3, window_bounds = array<i64: 256, 128>}, {pipeline_mode = #tpu.pipeline_mode<synchronous>, transform_indices = @transform_4, window_bounds = array<i64: 1, 128>}, {pipeline_mode = #tpu.pipeline_mode<synchronous>, transform_indices = @transform_5, window_bounds = array<i64: 1, 128>}, {pipeline_mode = #tpu.pipeline_mode<synchronous>, transform_indices = @transform_6, window_bounds = array<i64: 1, 128>}, {transform_indices = @transform_7, window_bounds = array<i64: 128, 128>}]} {
    %c0 = arith.constant 0 : index
    %c0_0 = arith.constant 0 : index
    %0 = vector.load %arg1[%c0, %c0_0] : memref<128x128xf32, #tpu.memory_space<vmem>>, vector<128x128xf32>
    %1 = arith.truncf %0 : vector<128x128xf32> to vector<128x128xbf16>
    %c0_1 = arith.constant 0 : index
    %c0_2 = arith.constant 0 : index
    %2 = vector.load %arg2[%c0_1, %c0_2] : memref<128x256xbf16, #tpu.memory_space<vmem>>, vector<128x256xbf16>
    %cst = arith.constant dense<0.000000e+00> : vector<128x256xf32>
    %3 = tpu.matmul %1, %2, %cst {dimension_numbers = #tpu.dot_dimension_numbers<[1], [0], [0], [1], [0, 0, 1, 1], [], []>} : vector<128x128xbf16>, vector<128x256xbf16>, vector<128x256xf32> -> vector<128x256xf32>
    %c0_3 = arith.constant 0 : index
    %c0_4 = arith.constant 0 : index
    %4 = vector.load %arg3[%c0_3, %c0_4] : memref<1x256xf32, #tpu.memory_space<vmem>>, vector<1x256xf32>
    %5 = vector.broadcast %4 : vector<1x256xf32> to vector<128x256xf32>
    %6 = arith.addf %3, %5 : vector<128x256xf32>
    %cst_5 = arith.constant 0.000000e+00 : f32
    %7 = vector.broadcast %cst_5 : f32 to vector<128x256xf32>
    %8 = arith.maximumf %6, %7 : vector<128x256xf32>
    %9 = arith.truncf %8 : vector<128x256xf32> to vector<128x256xbf16>
    %c0_6 = arith.constant 0 : index
    %c0_7 = arith.constant 0 : index
    %10 = vector.load %arg4[%c0_6, %c0_7] : memref<256x128xbf16, #tpu.memory_space<vmem>>, vector<256x128xbf16>
    %cst_8 = arith.constant dense<0.000000e+00> : vector<128x128xf32>
    %11 = tpu.matmul %9, %10, %cst_8 {dimension_numbers = #tpu.dot_dimension_numbers<[1], [0], [0], [1], [0, 0, 1, 1], [], []>} : vector<128x256xbf16>, vector<256x128xbf16>, vector<128x128xf32> -> vector<128x128xf32>
    %c0_9 = arith.constant 0 : index
    %c0_10 = arith.constant 0 : index
    %12 = vector.load %arg5[%c0_9, %c0_10] : memref<1x128xf32, #tpu.memory_space<vmem>>, vector<1x128xf32>
    %13 = vector.broadcast %12 : vector<1x128xf32> to vector<128x128xf32>
    %14 = arith.addf %11, %13 : vector<128x128xf32>
    %15 = arith.addf %0, %14 : vector<128x128xf32>
    %cst_11 = arith.constant dense<0.000000e+00> : vector<128xf32>
    %16 = vector.multi_reduction <add>, %15, %cst_11 [1] : vector<128x128xf32> to vector<128xf32>
    %17 = vector.shape_cast %16 : vector<128xf32> to vector<128x1xf32>
    %cst_12 = arith.constant 1.280000e+02 : f32
    %18 = vector.broadcast %cst_12 : f32 to vector<128x1xf32>
    %19 = arith.divf %17, %18 : vector<128x1xf32>
    %20 = vector.broadcast %19 : vector<128x1xf32> to vector<128x128xf32>
    %21 = arith.subf %15, %20 : vector<128x128xf32>
    %22 = arith.mulf %21, %21 : vector<128x128xf32>
    %cst_13 = arith.constant dense<0.000000e+00> : vector<128xf32>
    %23 = vector.multi_reduction <add>, %22, %cst_13 [1] : vector<128x128xf32> to vector<128xf32>
    %24 = vector.shape_cast %23 : vector<128xf32> to vector<128x1xf32>
    %cst_14 = arith.constant 1.280000e+02 : f32
    %25 = vector.broadcast %cst_14 : f32 to vector<128x1xf32>
    %26 = arith.divf %24, %25 : vector<128x1xf32>
    %cst_15 = arith.constant 9.99999974E-6 : f32
    %27 = vector.broadcast %cst_15 : f32 to vector<128x1xf32>
    %28 = arith.addf %26, %27 : vector<128x1xf32>
    %29 = math.rsqrt %28 : vector<128x1xf32>
    %30 = vector.broadcast %29 : vector<128x1xf32> to vector<128x128xf32>
    %31 = arith.mulf %21, %30 : vector<128x128xf32>
    %c0_16 = arith.constant 0 : index
    %c0_17 = arith.constant 0 : index
    %32 = vector.load %arg6[%c0_16, %c0_17] : memref<1x128xf32, #tpu.memory_space<vmem>>, vector<1x128xf32>
    %33 = vector.broadcast %32 : vector<1x128xf32> to vector<128x128xf32>
    %34 = arith.mulf %31, %33 : vector<128x128xf32>
    %c0_18 = arith.constant 0 : index
    %c0_19 = arith.constant 0 : index
    %35 = vector.load %arg7[%c0_18, %c0_19] : memref<1x128xf32, #tpu.memory_space<vmem>>, vector<1x128xf32>
    %36 = vector.broadcast %35 : vector<1x128xf32> to vector<128x128xf32>
    %37 = arith.addf %34, %36 : vector<128x128xf32>
    %c0_20 = arith.constant 0 : index
    %c0_21 = arith.constant 0 : index
    %38 = vector.load %arg8[%c0_20, %c0_21] : memref<128x128xf32, #tpu.memory_space<vmem>>, vector<128x128xf32>
    tpu.vector_store %arg8[%c0_20, %c0_21], %37 {strides = array<i32>} : memref<128x128xf32, #tpu.memory_space<vmem>>, vector<128x128xf32>,
    return
  }
  func.func @transform_0(%arg0: i32) -> (i32, i32) {
    %c0_i32 = arith.constant 0 : i32
    %c0_i32_0 = arith.constant 0 : i32
    return %arg0, %c0_i32 : i32, i32
  }
  func.func @transform_1(%arg0: i32) -> (i32, i32) {
    %c0_i32 = arith.constant 0 : i32
    %c0_i32_0 = arith.constant 0 : i32
    %c0_i32_1 = arith.constant 0 : i32
    return %c0_i32, %c0_i32_0 : i32, i32
  }
  func.func @transform_2(%arg0: i32) -> (i32, i32) {
    %c0_i32 = arith.constant 0 : i32
    %c0_i32_0 = arith.constant 0 : i32
    %c0_i32_1 = arith.constant 0 : i32
    return %c0_i32, %c0_i32_0 : i32, i32
  }
  func.func @transform_3(%arg0: i32) -> (i32, i32) {
    %c0_i32 = arith.constant 0 : i32
    %c0_i32_0 = arith.constant 0 : i32
    %c0_i32_1 = arith.constant 0 : i32
    return %c0_i32, %c0_i32_0 : i32, i32
  }
  func.func @transform_4(%arg0: i32) -> (i32, i32) {
    %c0_i32 = arith.constant 0 : i32
    %c0_i32_0 = arith.constant 0 : i32
    %c0_i32_1 = arith.constant 0 : i32
    return %c0_i32, %c0_i32_0 : i32, i32
  }
  func.func @transform_5(%arg0: i32) -> (i32, i32) {
    %c0_i32 = arith.constant 0 : i32
    %c0_i32_0 = arith.constant 0 : i32
    %c0_i32_1 = arith.constant 0 : i32
    return %c0_i32, %c0_i32_0 : i32, i32
  }
  func.func @transform_6(%arg0: i32) -> (i32, i32) {
    %c0_i32 = arith.constant 0 : i32
    %c0_i32_0 = arith.constant 0 : i32
    %c0_i32_1 = arith.constant 0 : i32
    return %c0_i32, %c0_i32_0 : i32, i32
  }
  func.func @transform_7(%arg0: i32) -> (i32, i32) {
    %c0_i32 = arith.constant 0 : i32
    %c0_i32_0 = arith.constant 0 : i32
    return %arg0, %c0_i32 : i32, i32
  }
}

</mosaic_0001>

<bundles_post_ra>
// kernel: tpu_custom_call.1
= control target key start
LH: loop header
LB: loop body
LE: loop exit
PB: predicated region body
PF: predicated region fallthrough
CT: control target
= control target key end

     0   :  { %12 = vsyncpa [#allocation3], 0  ;;  %s1572_s0 = inlined_call_operand.hbm [shape: f32[128,128], index: 0, kind: input, shape index: {}]   ;;  %s1573_s1 = inlined_call_operand.hbm [shape: bf16[128,256], index: 1, kind: input, shape index: {}]   ;;  %s1574_s2 = inlined_call_operand.vmem [shape: f32[1,256], index: 2, kind: input, shape index: {}]   ;;  %s1575_s3 = inlined_call_operand.hbm [shape: bf16[256,128], index: 3, kind: input, shape index: {}]   ;;  %s1576_s4 = inlined_call_operand.vmem [shape: f32[1,128], index: 4, kind: input, shape index: {}]   ;;  %s1577_s5 = inlined_call_operand.vmem [shape: f32[1,128], index: 5, kind: input, shape index: {}]   ;;  %s1578_s6 = inlined_call_operand.vmem [shape: f32[1,128], index: 6, kind: input, shape index: {}]   ;;  %s1579_s7 = inlined_call_operand.hbm [shape: f32[128,128], index: 7, kind: output, shape index: {}]  }
   0x1   :  { %13 = vsyncpa [#allocation6], 0 }
   0x2   :  { %14 = vsyncpa [#allocation4], 0  ;;  %s1141_s24 = smov [#allocation5]   ;;  %s1142_s26 = smov [#allocation2]  }
   0x3   :  { %s32_s25 = sshll.u32 %s1141_s24, 4  ;;  %s20_s27 = sshll.u32 %s1142_s26, 4  ;;  %s33_s25 = int_to_ptr.vmem [resolvable:$true] %s32_s25  ;;  %s1190_s27 = int_to_ptr.vmem [resolvable:$true] %s20_s27 }
   0x4   :  { %s1047_s30 = scalar_lea.hbm %s1573_s1, 2048 }
   0x5   :  { %p1048_p0 = scmp.ne.s32.totalorder %s1573_s1, %s1047_s30  ;;  %p1051_p1 = scmp.lt.u32.totalorder %s1047_s30, %s1573_s1 }
   0x7   :  { %p1053_p2 = pnand %p1051_p1, %p1048_p0 }
   0x9   :  { %1056 = shalt.err (!%p1053_p2)
}
   0xa   :  { %s1057_s12 = scalar_lea.vmem %s33_s25, 2048  ;;  %p1062_p4 = scmp.lt.s32.totalorder %s33_s25, %s33_s25 }
   0xb   :  { %p1058_p3 = scmp.ne.s32.totalorder %s33_s25, %s1057_s12  ;;  %p1063_p5 = scmp.lt.s32.totalorder %s1057_s12, %s1057_s12 }
   0xd   :  { %p1064_p6 = por %p1063_p5, %p1062_p4 }
   0xf   :  { %p1065_p7 = pnand %p1064_p6, %p1058_p3 }
  0x11   :  { %1068 = shalt.err (!%p1065_p7)
}
  0x12   :  { %s1143_s13 = smov 128   ;;  %s1144_s14 = smov 8  }
  0x13   :  { %38 = dma.hbm_to_vmem [thread:$0]  %s1573_s1, 2048, %s33_s25, [#allocation6], %s1143_s13, %s1143_s13, %s1144_s14  }
  0x14   :  { %s1069_s19 = scalar_lea.hbm %s1572_s0, 2048 }
  0x15   :  { %p1070_p8 = scmp.ne.s32.totalorder %s1572_s0, %s1069_s19  ;;  %p1073_p9 = scmp.lt.u32.totalorder %s1069_s19, %s1572_s0 }
  0x17   :  { %p1075_p10 = pnand %p1073_p9, %p1070_p8 }
  0x19   :  { %1078 = shalt.err (!%p1075_p10)
}
  0x1a   :  { %s1079_s24 = scalar_lea.vmem %s1190_s27, 2048  ;;  %p1084_p12 = scmp.lt.s32.totalorder %s1190_s27, %s1190_s27 }
  0x1b   :  { %p1080_p11 = scmp.ne.s32.totalorder %s1190_s27, %s1079_s24  ;;  %p1085_p13 = scmp.lt.s32.totalorder %s1079_s24, %s1079_s24 }
  0x1d   :  { %p1086_p0 = por %p1085_p13, %p1084_p12 }
  0x1f   :  { %p1087_p1 = pnand %p1086_p0, %p1080_p11 }
  0x21   :  { %1090 = shalt.err (!%p1087_p1)
}
  0x22   :  { %26 = dma.hbm_to_vmem [thread:$0]  %s1572_s0, 2048, %s1190_s27, [#allocation3], %s1143_s13, %s1143_s13, %s1144_s14  }
  0x23   :  { %s1145_s26 = smov [#allocation7]   ;;  %s1091_s8 = scalar_lea.hbm %s1575_s3, 2048 }
  0x24   :  { %s46_s28 = sshll.u32 %s1145_s26, 4  ;;  %p1092_p2 = scmp.ne.s32.totalorder %s1575_s3, %s1091_s8  ;;  %s47_s28 = int_to_ptr.vmem [resolvable:$true] %s46_s28 }
  0x25   :  { %p1095_p3 = scmp.lt.u32.totalorder %s1091_s8, %s1575_s3 }
  0x27   :  { %p1097_p4 = pnand %p1095_p3, %p1092_p2 }
  0x29   :  { %1100 = shalt.err (!%p1097_p4)
}
  0x2a   :  { %s1101_s15 = scalar_lea.vmem %s47_s28, 2048  ;;  %p1106_p6 = scmp.lt.s32.totalorder %s47_s28, %s47_s28 }
  0x2b   :  { %p1102_p5 = scmp.ne.s32.totalorder %s47_s28, %s1101_s15  ;;  %p1107_p7 = scmp.lt.s32.totalorder %s1101_s15, %s1101_s15 }
  0x2d   :  { %p1108_p8 = por %p1107_p7, %p1106_p6 }
  0x2f   :  { %p1109_p9 = pnand %p1108_p8, %p1102_p5 }
  0x31   :  { %1112 = shalt.err (!%p1109_p9)
}
  0x32   :  { %s1146_s0 = smov 64   ;;  %s1147_s27 = smov 4  }
  0x33   :  { %52 = dma.hbm_to_vmem [thread:$0]  %s1575_s3, 2048, %s47_s28, [#allocation6], %s1146_s0, %s1146_s0, %s1147_s27  }
  0x34   :  { %1135 = dma.done.wait [#allocation3], 2048  }
  0x35   :  { %1136 = vsyncadd [#allocation3], 4294965248 }
  0x36   :  { %1137 = dma.done.wait [#allocation6], 4096  }
  0x37   :  { %1138 = vsyncadd [#allocation6], 4294963200  ;;  %v1148_v0 = vmov 0   ;;  %v975_v1 = vld [vmem:[#allocation5 + $0x4] ss:$8 sps:$4 sm:$0xff]   ;;  %v1003_v18 = vld [vmem:[#allocation7 + $0x50] sm:$0xff]   ;;  %v111_v57 = vlaneseq }
  0x38   :  { %233 = vmatprep.mubr.bf16.mxu0 %v1148_v0  ;;  %v977_v2 = vld [vmem:[#allocation5] ss:$8 sps:$4 sm:$0xff]   ;;  %201 = vmatprep.subr.bf16.mxu0 %v975_v1  ;;  %v978_v3 = vld [vmem:[#allocation5 + $0x14] ss:$8 sps:$4 sm:$0xff]   ;;  %v980_v4 = vld [vmem:[#allocation5 + $0x10] ss:$8 sps:$4 sm:$0xff]  }
  0x39   :  { %202 = vmatpush1.bf16.msra.mxu0 %v977_v2  ;;  %v981_v5 = vld [vmem:[#allocation5 + $0x24] ss:$8 sps:$4 sm:$0xff]   ;;  %v983_v6 = vld [vmem:[#allocation5 + $0x20] ss:$8 sps:$4 sm:$0xff]   ;;  %v984_v7 = vld [vmem:[#allocation5 + $0x34] ss:$8 sps:$4 sm:$0xff]  }
  0x3a   :  { %203 = vmatprep.subr.bf16.mxu0 %v978_v3  ;;  %v986_v8 = vld [vmem:[#allocation5 + $0x30] ss:$8 sps:$4 sm:$0xff]   ;;  %v987_v9 = vld [vmem:[#allocation5 + $0x44] ss:$8 sps:$4 sm:$0xff]   ;;  %v989_v10 = vld [vmem:[#allocation5 + $0x40] ss:$8 sps:$4 sm:$0xff]  }
  0x3b   :  { %v990_v11 = vld [vmem:[#allocation5 + $0x54] ss:$8 sps:$4 sm:$0xff]   ;;  %v999_v12 = vld [vmem:[#allocation7 + $0x40] sm:$0xff]   ;;  %v992_v13 = vld [vmem:[#allocation5 + $0x50] ss:$8 sps:$4 sm:$0xff]   ;;  %v112_v58 = vshrl.u32 %v111_v57, 7 }
  0x3c   :  { %v1000_v14 = vld [vmem:[#allocation7] sm:$0xff]   ;;  %902 = vmatprep.subr.bf16.mxu1 %v999_v12  ;;  %v1001_v16 = vld [vmem:[#allocation7 + $0x48] sm:$0xff]   ;;  %v996_v20 = vld [vmem:[#allocation5 + $0x74] ss:$8 sps:$4 sm:$0xff]  }
  0x3d   :  { %204 = vmatpush1.bf16.msra.mxu0 %v980_v4  ;;  %v993_v15 = vld [vmem:[#allocation5 + $0x64] ss:$8 sps:$4 sm:$0xff]   ;;  %903 = vmatpush3.bf16.msra.mxu1 %v1000_v14  ;;  %v995_v19 = vld [vmem:[#allocation5 + $0x60] ss:$8 sps:$4 sm:$0xff]   ;;  %v1004_v21 = vld [vmem:[#allocation7 + $0x10] sm:$0xff]   ;;  %v113_v59 = vsub.s32 0, %v112_v58 }
  0x3e   :  { %205 = vmatprep.subr.bf16.mxu0 %v981_v5  ;;  %v1002_v17 = vld [vmem:[#allocation7 + $0x8] sm:$0xff]   ;;  %904 = vmatprep.subr.bf16.mxu1 %v1001_v16  ;;  %v1005_v22 = vld [vmem:[#allocation7 + $0x58] sm:$0xff]   ;;  %v1240_v24 = vld [vmem:[#allocation2] sm:$0xff]  ;;  %v117_v61 = vsub.s32 1, %v112_v58 }
  0x3f   :  { %v998_v23 = vld [vmem:[#allocation5 + $0x70] ss:$8 sps:$4 sm:$0xff]   ;;  %v1242_v25 = vld [vmem:[#allocation2 + $0x8] sm:$0xff]  ;;  %v1007_v27 = vld [vmem:[#allocation7 + $0x60] sm:$0xff]  }
  0x40   :  { %v1006_v26 = vld [vmem:[#allocation7 + $0x18] sm:$0xff]   ;;  %v85_v28 = vpack.c.bf16 %v1242_v25, %v1240_v24  ;;  %v1008_v29 = vld [vmem:[#allocation7 + $0x20] sm:$0xff]   ;;  %v1009_v30 = vld [vmem:[#allocation7 + $0x68] sm:$0xff]  }
  0x41   :  { %206 = vmatpush1.bf16.msra.mxu0 %v983_v6  ;;  %905 = vmatpush3.bf16.msra.mxu1 %v1002_v17  ;;  %v1247_v31 = vld [vmem:[#allocation2 + $0x10] sm:$0xff]  ;;  %v1249_v32 = vld [vmem:[#allocation2 + $0x18] sm:$0xff]  ;;  %v1254_v34 = vld [vmem:[#allocation2 + $0x20] sm:$0xff] }
  0x42   :  { %207 = vmatprep.subr.bf16.mxu0 %v984_v7  ;;  %906 = vmatprep.subr.bf16.mxu1 %v1003_v18  ;;  %v86_v33 = vpack.c.bf16 %v1249_v32, %v1247_v31  ;;  %v1256_v35 = vld [vmem:[#allocation2 + $0x28] sm:$0xff]  ;;  %v1261_v37 = vld [vmem:[#allocation2 + $0x30] sm:$0xff]  ;;  %v1263_v38 = vld [vmem:[#allocation2 + $0x38] sm:$0xff] }
  0x43   :  { %v87_v36 = vpack.c.bf16 %v1256_v35, %v1254_v34  ;;  %v88_v39 = vpack.c.bf16 %v1263_v38, %v1261_v37  ;;  %v1268_v40 = vld [vmem:[#allocation2 + $0x40] sm:$0xff]  ;;  %v1270_v41 = vld [vmem:[#allocation2 + $0x48] sm:$0xff]  ;;  %v1275_v43 = vld [vmem:[#allocation2 + $0x50] sm:$0xff] }
  0x44   :  { %v89_v42 = vpack.c.bf16 %v1270_v41, %v1268_v40  ;;  %v1277_v44 = vld [vmem:[#allocation2 + $0x58] sm:$0xff]  ;;  %v1282_v46 = vld [vmem:[#allocation2 + $0x60] sm:$0xff]  ;;  %v1284_v47 = vld [vmem:[#allocation2 + $0x68] sm:$0xff] }
  0x45   :  { %208 = vmatpush1.bf16.msra.mxu0 %v986_v8  ;;  %907 = vmatpush3.bf16.msra.mxu1 %v1004_v21  ;;  %v90_v45 = vpack.c.bf16 %v1277_v44, %v1275_v43  ;;  %v91_v48 = vpack.c.bf16 %v1284_v47, %v1282_v46  ;;  %v1289_v49 = vld [vmem:[#allocation2 + $0x70] sm:$0xff]  ;;  %v1291_v50 = vld [vmem:[#allocation2 + $0x78] sm:$0xff]  ;;  %v1010_v52 = vld [vmem:[#allocation7 + $0x28] sm:$0xff]  }
  0x46   :  { %209 = vmatprep.subr.bf16.mxu0 %v987_v9  ;;  %908 = vmatprep.subr.bf16.mxu1 %v1005_v22  ;;  %v92_v51 = vpack.c.bf16 %v1291_v50, %v1289_v49  ;;  %v1011_v53 = vld [vmem:[#allocation7 + $0x70] sm:$0xff]   ;;  %v1013_v55 = vld [vmem:[#allocation7 + $0x78] sm:$0xff]   ;;  %v109_v60 = vld [vmem:[%s1574_s2] sm:$0x3] }
  0x47   :  { %v1012_v54 = vld [vmem:[#allocation7 + $0x30] sm:$0xff]   ;;  %v1014_v56 = vld [vmem:[#allocation7 + $0x38] sm:$0xff]   ;;  %v1298_v62 = vrot.slane %v109_v60, %v113_v59  ;;  %v1300_v63 = vrot.slane %v109_v60, %v117_v61 }
  0x49   :  { %210 = vmatpush1.bf16.msra.mxu0 %v989_v10  ;;  %909 = vmatpush3.bf16.msra.mxu1 %v1006_v26 }
  0x4a   :  { %211 = vmatprep.subr.bf16.mxu0 %v990_v11  ;;  %910 = vmatprep.subr.bf16.mxu1 %v1007_v27 }
  0x4d   :  { %212 = vmatpush1.bf16.msra.mxu0 %v992_v13  ;;  %911 = vmatpush3.bf16.msra.mxu1 %v1008_v29 }
  0x4e   :  { %213 = vmatprep.subr.bf16.mxu0 %v993_v15  ;;  %912 = vmatprep.subr.bf16.mxu1 %v1009_v30 }
  0x51   :  { %214 = vmatpush1.bf16.msra.mxu0 %v995_v19  ;;  %913 = vmatpush3.bf16.msra.mxu1 %v1010_v52 }
  0x52   :  { %215 = vmatprep.subr.bf16.mxu0 %v996_v20  ;;  %914 = vmatprep.subr.bf16.mxu1 %v1011_v53 }
  0x55   :  { %216 = vmatpush1.bf16.msra.mxu0 %v998_v23  ;;  %915 = vmatpush3.bf16.msra.mxu1 %v1012_v54 }
  0x56   :  { %916 = vmatprep.subr.bf16.mxu1 %v1013_v55 }
  0x58   :  { %234 = vmatmul.mubr.bf16.vlgmr.msra.gmra.mrb[0].mxu0 %v85_v28 }
  0x59   :  { %243 = vmatprep.mubr.bf16.mxu0 %v1148_v0  ;;  %917 = vmatpush3.bf16.msra.mxu1 %v1014_v56 }
  0x60   :  { %244 = vmatmul.mubr.bf16.gmra.mrb[4].mxu0 %v86_v33 }
  0x61   :  { %253 = vmatprep.mubr.bf16.mxu0 %v1148_v0 }
  0x68   :  { %254 = vmatmul.mubr.bf16.gmra.mrb[8].mxu0 %v87_v36 }
  0x69   :  { %263 = vmatprep.mubr.bf16.mxu0 %v1148_v0 }
  0x70   :  { %264 = vmatmul.mubr.bf16.gmra.mrb[12].mxu0 %v88_v39 }
  0x71   :  { %273 = vmatprep.mubr.bf16.mxu0 %v1148_v0 }
  0x78   :  { %274 = vmatmul.mubr.bf16.gmra.mrb[16].mxu0 %v89_v42 }
  0x79   :  { %283 = vmatprep.mubr.bf16.mxu0 %v1148_v0 }
  0x80   :  { %284 = vmatmul.mubr.bf16.gmra.mrb[20].mxu0 %v90_v45 }
  0x81   :  { %293 = vmatprep.mubr.bf16.mxu0 %v1148_v0 }
  0x88   :  { %294 = vmatmul.mubr.bf16.gmra.mrb[24].mxu0 %v91_v48 }
  0x89   :  { %303 = vmatprep.mubr.bf16.mxu0 %v1148_v0 }
  0x90   :  { %304 = vmatmul.mubr.bf16.gmra.mrb[28].mxu0 %v92_v51 }
 0x12b   :  { %v235_v0 = vpop.f32.mrb[0].mxu0 }
 0x12c   :  { %v236_v1 = vadd.f32 %v235_v0, %v1298_v62  ;;  %v237_v2 = vpop.f32.mrb[1].mxu0 }
 0x12d   :  { %v238_v3 = vadd.f32 %v237_v2, %v1300_v63  ;;  %v239_v4 = vpop.f32.mrb[2].mxu0 }
 0x12e   :  { %v240_v5 = vadd.f32 %v239_v4, %v1298_v62  ;;  %v241_v6 = vpop.f32.mrb[3].mxu0  ;;  %v314_v8 = vmax.f32 %v236_v1, 0.0 }
 0x12f   :  { %v242_v7 = vadd.f32 %v241_v6, %v1300_v63  ;;  %v315_v10 = vmax.f32 %v238_v3, 0.0 }
 0x130   :  { %v316_v9 = vmax.f32 %v240_v5, 0.0 }
 0x131   :  { %v317_v11 = vmax.f32 %v242_v7, 0.0 }
 0x132   :  { %v346_v12 = vpack.c.bf16 %v316_v9, %v314_v8 }
 0x133   :  { %v245_v13 = vpop.f32.mrb[4].mxu0  ;;  %v347_v14 = vpack.c.bf16 %v317_v11, %v315_v10 }
 0x134   :  { %v246_v15 = vadd.f32 %v245_v13, %v1298_v62  ;;  %v247_v16 = vpop.f32.mrb[5].mxu0 }
 0x135   :  { %v248_v17 = vadd.f32 %v247_v16, %v1300_v63  ;;  %v249_v18 = vpop.f32.mrb[6].mxu0  ;;  %529 = vmatprep.mubr.bf16.mxu1 %v347_v14 }
 0x136   :  { %v250_v19 = vadd.f32 %v249_v18, %v1298_v62  ;;  %v251_v20 = vpop.f32.mrb[7].mxu0  ;;  %530 = vmatmul.mubr.bf16.vlgmr.msra.gmra.mrb[0].mxu1 %v346_v12  ;;  %v318_v22 = vmax.f32 %v246_v15, 0.0 }
 0x137   :  { %v252_v21 = vadd.f32 %v251_v20, %v1300_v63  ;;  %v319_v26 = vmax.f32 %v248_v17, 0.0 }
 0x138   :  { %v320_v23 = vmax.f32 %v250_v19, 0.0 }
 0x139   :  { %v321_v27 = vmax.f32 %v252_v21, 0.0 }
 0x13a   :  { %v348_v28 = vpack.c.bf16 %v320_v23, %v318_v22 }
 0x13b   :  { %v349_v29 = vpack.c.bf16 %v321_v27, %v319_v26  ;;  %v255_v30 = vpop.f32.mrb[8].mxu0 }
 0x13c   :  { %v256_v33 = vadd.f32 %v255_v30, %v1298_v62  ;;  %v257_v36 = vpop.f32.mrb[9].mxu0 }
 0x13d   :  { %v258_v39 = vadd.f32 %v257_v36, %v1300_v63  ;;  %v259_v42 = vpop.f32.mrb[10].mxu0  ;;  %537 = vmatprep.mubr.bf16.mxu1 %v349_v29 }
 0x13e   :  { %v260_v45 = vadd.f32 %v259_v42, %v1298_v62  ;;  %v261_v48 = vpop.f32.mrb[11].mxu0  ;;  %538 = vmatmul.mubr.bf16.gmra.mrb[4].mxu1 %v348_v28  ;;  %v322_v52 = vmax.f32 %v256_v33, 0.0 }
 0x13f   :  { %v262_v51 = vadd.f32 %v261_v48, %v1300_v63  ;;  %v323_v54 = vmax.f32 %v258_v39, 0.0 }
 0x140   :  { %v324_v53 = vmax.f32 %v260_v45, 0.0 }
 0x141   :  { %v325_v55 = vmax.f32 %v262_v51, 0.0 }
 0x142   :  { %v350_v56 = vpack.c.bf16 %v324_v53, %v322_v52 }
 0x143   :  { %v351_v57 = vpack.c.bf16 %v325_v55, %v323_v54  ;;  %v265_v58 = vpop.f32.mrb[12].mxu0 }
 0x144   :  { %v266_v59 = vadd.f32 %v265_v58, %v1298_v62  ;;  %v267_v60 = vpop.f32.mrb[13].mxu0 }
 0x145   :  { %v268_v61 = vadd.f32 %v267_v60, %v1300_v63  ;;  %v269_v0 = vpop.f32.mrb[14].mxu0  ;;  %545 = vmatprep.mubr.bf16.mxu1 %v351_v57 }
 0x146   :  { %v270_v1 = vadd.f32 %v269_v0, %v1298_v62  ;;  %v271_v2 = vpop.f32.mrb[15].mxu0  ;;  %546 = vmatmul.mubr.bf16.gmra.mrb[8].mxu1 %v350_v56  ;;  %v326_v4 = vmax.f32 %v266_v59, 0.0 }
 0x147   :  { %v272_v3 = vadd.f32 %v271_v2, %v1300_v63  ;;  %v327_v6 = vmax.f32 %v268_v61, 0.0 }
 0x148   :  { %v328_v5 = vmax.f32 %v270_v1, 0.0 }
 0x149   :  { %v329_v7 = vmax.f32 %v272_v3, 0.0 }
 0x14a   :  { %v352_v8 = vpack.c.bf16 %v328_v5, %v326_v4 }
 0x14b   :  { %v353_v9 = vpack.c.bf16 %v329_v7, %v327_v6  ;;  %v275_v10 = vpop.f32.mrb[16].mxu0 }
 0x14c   :  { %v276_v11 = vadd.f32 %v275_v10, %v1298_v62  ;;  %v277_v12 = vpop.f32.mrb[17].mxu0 }
 0x14d   :  { %v278_v13 = vadd.f32 %v277_v12, %v1300_v63  ;;  %v279_v14 = vpop.f32.mrb[18].mxu0  ;;  %553 = vmatprep.mubr.bf16.mxu1 %v353_v9 }
 0x14e   :  { %v280_v15 = vadd.f32 %v279_v14, %v1298_v62  ;;  %v281_v16 = vpop.f32.mrb[19].mxu0  ;;  %554 = vmatmul.mubr.bf16.gmra.mrb[12].mxu1 %v352_v8  ;;  %v330_v18 = vmax.f32 %v276_v11, 0.0 }
 0x14f   :  { %v282_v17 = vadd.f32 %v281_v16, %v1300_v63  ;;  %v331_v20 = vmax.f32 %v278_v13, 0.0 }
 0x150   :  { %v332_v19 = vmax.f32 %v280_v15, 0.0 }
 0x151   :  { %v333_v21 = vmax.f32 %v282_v17, 0.0 }
 0x152   :  { %v354_v22 = vpack.c.bf16 %v332_v19, %v330_v18 }
 0x153   :  { %v355_v23 = vpack.c.bf16 %v333_v21, %v331_v20  ;;  %v285_v26 = vpop.f32.mrb[20].mxu0  ;;  %v1337_v21 = vld [vmem:[%s1576_s4] ss:$0 sm:$0xff] }
 0x154   :  { %v286_v27 = vadd.f32 %v285_v26, %v1298_v62  ;;  %v287_v28 = vpop.f32.mrb[21].mxu0 }
 0x155   :  { %v288_v29 = vadd.f32 %v287_v28, %v1300_v63  ;;  %v289_v30 = vpop.f32.mrb[22].mxu0  ;;  %561 = vmatprep.mubr.bf16.mxu1 %v355_v23 }
 0x156   :  { %v290_v33 = vadd.f32 %v289_v30, %v1298_v62  ;;  %v291_v36 = vpop.f32.mrb[23].mxu0  ;;  %562 = vmatmul.mubr.bf16.gmra.mrb[16].mxu1 %v354_v22  ;;  %v334_v42 = vmax.f32 %v286_v27, 0.0 }
 0x157   :  { %v292_v39 = vadd.f32 %v291_v36, %v1300_v63  ;;  %v335_v48 = vmax.f32 %v288_v29, 0.0 }
 0x158   :  { %v336_v45 = vmax.f32 %v290_v33, 0.0 }
 0x159   :  { %v337_v51 = vmax.f32 %v292_v39, 0.0 }
 0x15a   :  { %v356_v52 = vpack.c.bf16 %v336_v45, %v334_v42 }
 0x15b   :  { %v357_v53 = vpack.c.bf16 %v337_v51, %v335_v48  ;;  %v295_v54 = vpop.f32.mrb[24].mxu0 }
 0x15c   :  { %v296_v55 = vadd.f32 %v295_v54, %v1298_v62  ;;  %v297_v56 = vpop.f32.mrb[25].mxu0 }
 0x15d   :  { %v298_v57 = vadd.f32 %v297_v56, %v1300_v63  ;;  %v299_v58 = vpop.f32.mrb[26].mxu0  ;;  %569 = vmatprep.mubr.bf16.mxu1 %v357_v53 }
 0x15e   :  { %v300_v59 = vadd.f32 %v299_v58, %v1298_v62  ;;  %v301_v60 = vpop.f32.mrb[27].mxu0  ;;  %570 = vmatmul.mubr.bf16.gmra.mrb[20].mxu1 %v356_v52  ;;  %v338_v0 = vmax.f32 %v296_v55, 0.0 }
 0x15f   :  { %v302_v61 = vadd.f32 %v301_v60, %v1300_v63  ;;  %v339_v2 = vmax.f32 %v298_v57, 0.0 }
 0x160   :  { %v340_v1 = vmax.f32 %v300_v59, 0.0 }
 0x161   :  { %v341_v3 = vmax.f32 %v302_v61, 0.0 }
 0x162   :  { %v358_v4 = vpack.c.bf16 %v340_v1, %v338_v0 }
 0x163   :  { %v359_v5 = vpack.c.bf16 %v341_v3, %v339_v2  ;;  %v305_v6 = vpop.f32.mrb[28].mxu0 }
 0x164   :  { %v306_v7 = vadd.f32 %v305_v6, %v1298_v62  ;;  %v307_v8 = vpop.f32.mrb[29].mxu0 }
 0x165   :  { %v308_v9 = vadd.f32 %v307_v8, %v1300_v63  ;;  %v309_v10 = vpop.f32.mrb[30].mxu0  ;;  %577 = vmatprep.mubr.bf16.mxu1 %v359_v5 }
 0x166   :  { %v310_v11 = vadd.f32 %v309_v10, %v1298_v62  ;;  %v311_v12 = vpop.f32.mrb[31].mxu0  ;;  %578 = vmatmul.mubr.bf16.gmra.mrb[24].mxu1 %v358_v4  ;;  %v342_v14 = vmax.f32 %v306_v7, 0.0 }
 0x167   :  { %v312_v13 = vadd.f32 %v311_v12, %v1300_v63  ;;  %v343_v16 = vmax.f32 %v308_v9, 0.0 }
 0x168   :  { %v344_v15 = vmax.f32 %v310_v11, 0.0 }
 0x169   :  { %v345_v17 = vmax.f32 %v312_v13, 0.0 }
 0x16a   :  { %v360_v18 = vpack.c.bf16 %v344_v15, %v342_v14 }
 0x16b   :  { %v361_v19 = vpack.c.bf16 %v345_v17, %v343_v16 }
 0x16d   :  { %585 = vmatprep.mubr.bf16.mxu1 %v361_v19 }
 0x16e   :  { %586 = vmatmul.mubr.bf16.gmra.mrb[28].mxu1 %v360_v18 }
 0x209   :  { %v918_v20 = vpop.f32.mrb[0].mxu1 }
 0x20a   :  { %v919_v22 = vpop.f32.mrb[1].mxu1 }
 0x20b   :  { %v920_v62 = vadd.f32 %v919_v22, %v918_v20  ;;  %v921_v23 = vpop.f32.mrb[2].mxu1 }
 0x20c   :  { %v922_v26 = vpop.f32.mrb[3].mxu1 }
 0x20d   :  { %v532_v63 = vadd.f32 %v920_v62, %v1337_v21  ;;  %v923_v27 = vadd.f32 %v922_v26, %v921_v23 }
 0x20f   :  { %v535_v28 = vadd.f32 %v923_v27, %v1337_v21  ;;  %v1342_v29 = vadd.f32 %v532_v63, %v1240_v24 }
 0x211   :  { %v924_v30 = vpop.f32.mrb[4].mxu1  ;;  %610 = vadd.xlane.f32.xlu0 %v1342_v29  ;;  %v1346_v42 = vadd.f32 %v535_v28, %v1242_v25 }
 0x212   :  { %v925_v33 = vpop.f32.mrb[5].mxu1 }
 0x213   :  { %v926_v36 = vadd.f32 %v925_v33, %v924_v30  ;;  %v927_v39 = vpop.f32.mrb[6].mxu1 }
 0x214   :  { %v928_v45 = vpop.f32.mrb[7].mxu1 }
 0x215   :  { %v540_v48 = vadd.f32 %v926_v36, %v1337_v21  ;;  %v929_v51 = vadd.f32 %v928_v45, %v927_v39  ;;  %612 = vadd.xlane.f32.xlu0 %v1346_v42 }
 0x217   :  { %v543_v52 = vadd.f32 %v929_v51, %v1337_v21  ;;  %v1352_v24 = vadd.f32 %v540_v48, %v1247_v31 }
 0x219   :  { %v930_v53 = vpop.f32.mrb[8].mxu1  ;;  %614 = vadd.xlane.f32.xlu1 %v1352_v24  ;;  %v1356_v25 = vadd.f32 %v543_v52, %v1249_v32 }
 0x21a   :  { %v931_v54 = vpop.f32.mrb[9].mxu1 }
 0x21b   :  { %v932_v55 = vadd.f32 %v931_v54, %v930_v53  ;;  %v933_v56 = vpop.f32.mrb[10].mxu1 }
 0x21c   :  { %v934_v57 = vpop.f32.mrb[11].mxu1 }
 0x21d   :  { %v548_v58 = vadd.f32 %v932_v55, %v1337_v21  ;;  %v935_v59 = vadd.f32 %v934_v57, %v933_v56  ;;  %616 = vadd.xlane.f32.xlu1 %v1356_v25 }
 0x21f   :  { %v551_v60 = vadd.f32 %v935_v59, %v1337_v21  ;;  %v1362_v31 = vadd.f32 %v548_v58, %v1254_v34 }
 0x221   :  { %v936_v61 = vpop.f32.mrb[12].mxu1  ;;  %618 = vadd.xlane.f32.xlu0 %v1362_v31  ;;  %v1366_v0 = vadd.f32 %v551_v60, %v1256_v35 }
 0x222   :  { %v937_v1 = vpop.f32.mrb[13].mxu1 }
 0x223   :  { %v938_v32 = vadd.f32 %v937_v1, %v936_v61  ;;  %v939_v2 = vpop.f32.mrb[14].mxu1  ;;  %620 = vadd.xlane.f32.xlu1 %v1366_v0 }
 0x224   :  { %v940_v3 = vpop.f32.mrb[15].mxu1 }
 0x225   :  { %v556_v4 = vadd.f32 %v938_v32, %v1337_v21  ;;  %v941_v5 = vadd.f32 %v940_v3, %v939_v2 }
 0x227   :  { %v559_v6 = vadd.f32 %v941_v5, %v1337_v21  ;;  %v1372_v34 = vadd.f32 %v556_v4, %v1261_v37 }
 0x229   :  { %v942_v7 = vpop.f32.mrb[16].mxu1  ;;  %622 = vadd.xlane.f32.xlu0 %v1372_v34  ;;  %v1376_v35 = vadd.f32 %v559_v6, %v1263_v38 }
 0x22a   :  { %v943_v8 = vpop.f32.mrb[17].mxu1 }
 0x22b   :  { %v944_v9 = vadd.f32 %v943_v8, %v942_v7  ;;  %v945_v10 = vpop.f32.mrb[18].mxu1  ;;  %624 = vadd.xlane.f32.xlu1 %v1376_v35 }
 0x22c   :  { %v946_v11 = vpop.f32.mrb[19].mxu1 }
 0x22d   :  { %v564_v12 = vadd.f32 %v944_v9, %v1337_v21  ;;  %v947_v13 = vadd.f32 %v946_v11, %v945_v10 }
 0x22f   :  { %v567_v14 = vadd.f32 %v947_v13, %v1337_v21  ;;  %v1382_v37 = vadd.f32 %v564_v12, %v1268_v40 }
 0x231   :  { %v948_v15 = vpop.f32.mrb[20].mxu1  ;;  %626 = vadd.xlane.f32.xlu0 %v1382_v37  ;;  %v1386_v38 = vadd.f32 %v567_v14, %v1270_v41 }
 0x232   :  { %v949_v16 = vpop.f32.mrb[21].mxu1 }
 0x233   :  { %v950_v17 = vadd.f32 %v949_v16, %v948_v15  ;;  %v951_v18 = vpop.f32.mrb[22].mxu1  ;;  %628 = vadd.xlane.f32.xlu1 %v1386_v38 }
 0x234   :  { %v952_v19 = vpop.f32.mrb[23].mxu1 }
 0x235   :  { %v572_v20 = vadd.f32 %v950_v17, %v1337_v21  ;;  %v953_v22 = vadd.f32 %v952_v19, %v951_v18 }
 0x237   :  { %v575_v62 = vadd.f32 %v953_v22, %v1337_v21  ;;  %v1392_v40 = vadd.f32 %v572_v20, %v1275_v43 }
 0x239   :  { %v954_v23 = vpop.f32.mrb[24].mxu1  ;;  %630 = vadd.xlane.f32.xlu0 %v1392_v40  ;;  %v1396_v41 = vadd.f32 %v575_v62, %v1277_v44 }
 0x23a   :  { %v955_v26 = vpop.f32.mrb[25].mxu1 }
 0x23b   :  { %v956_v63 = vadd.f32 %v955_v26, %v954_v23  ;;  %v957_v27 = vpop.f32.mrb[26].mxu1  ;;  %632 = vadd.xlane.f32.xlu1 %v1396_v41 }
 0x23c   :  { %v958_v28 = vpop.f32.mrb[27].mxu1 }
 0x23d   :  { %v580_v30 = vadd.f32 %v956_v63, %v1337_v21  ;;  %v959_v33 = vadd.f32 %v958_v28, %v957_v27 }
 0x23f   :  { %v583_v36 = vadd.f32 %v959_v33, %v1337_v21  ;;  %v1402_v43 = vadd.f32 %v580_v30, %v1282_v46 }
 0x241   :  { %v960_v39 = vpop.f32.mrb[28].mxu1  ;;  %634 = vadd.xlane.f32.xlu0 %v1402_v43  ;;  %v1406_v44 = vadd.f32 %v583_v36, %v1284_v47 }
 0x242   :  { %v961_v45 = vpop.f32.mrb[29].mxu1 }
 0x243   :  { %v962_v48 = vadd.f32 %v961_v45, %v960_v39  ;;  %v963_v51 = vpop.f32.mrb[30].mxu1  ;;  %636 = vadd.xlane.f32.xlu1 %v1406_v44 }
 0x244   :  { %v964_v52 = vpop.f32.mrb[31].mxu1 }
 0x245   :  { %v588_v53 = vadd.f32 %v962_v48, %v1337_v21  ;;  %v965_v54 = vadd.f32 %v964_v52, %v963_v51 }
 0x247   :  { %v591_v55 = vadd.f32 %v965_v54, %v1337_v21  ;;  %v1412_v46 = vadd.f32 %v588_v53, %v1289_v49 }
 0x249   :  { %638 = vadd.xlane.f32.xlu0 %v1412_v46  ;;  %v1416_v56 = vadd.f32 %v591_v55, %v1291_v50 }
 0x24b   :  { %640 = vadd.xlane.f32.xlu1 %v1416_v56 }
 0x29e   :  { %v611_v47 = vpop.xlane.xlu0 %610 }
 0x29f   :  { %v643_v57 = vmul.f32 0.0078125, %v611_v47 }
 0x2a1   :  { %v1420_v58 = vsub.f32 %v1342_v29, %v643_v57 }
 0x2a2   :  { %v613_v59 = vpop.xlane.xlu0 %612 }
 0x2a3   :  { %v644_v60 = vmul.f32 0.0078125, %v613_v59  ;;  %v675_v21 = vmul.f32 %v1420_v58, %v1420_v58 }
 0x2a5   :  { %v1425_v49 = vsub.f32 %v1346_v42, %v644_v60  ;;  %691 = vadd.xlane.f32.xlu0 %v675_v21 }
 0x2a6   :  { %v615_v61 = vpop.xlane.xlu1 %614 }
 0x2a7   :  { %v645_v1 = vmul.f32 0.0078125, %v615_v61  ;;  %v676_v50 = vmul.f32 %v1425_v49, %v1425_v49 }
 0x2a9   :  { %v1430_v32 = vsub.f32 %v1352_v24, %v645_v1  ;;  %693 = vadd.xlane.f32.xlu1 %v676_v50 }
 0x2aa   :  { %v617_v29 = vpop.xlane.xlu1 %616 }
 0x2ab   :  { %v646_v2 = vmul.f32 0.0078125, %v617_v29  ;;  %v677_v3 = vmul.f32 %v1430_v32, %v1430_v32 }
 0x2ad   :  { %v1435_v4 = vsub.f32 %v1356_v25, %v646_v2  ;;  %695 = vadd.xlane.f32.xlu0 %v677_v3 }
 0x2ae   :  { %v619_v42 = vpop.xlane.xlu0 %618 }
 0x2af   :  { %v647_v5 = vmul.f32 0.0078125, %v619_v42  ;;  %v678_v6 = vmul.f32 %v1435_v4, %v1435_v4 }
 0x2b0   :  { %v621_v7 = vpop.xlane.xlu1 %620 }
 0x2b1   :  { %v1440_v8 = vsub.f32 %v1362_v31, %v647_v5  ;;  %v648_v24 = vmul.f32 0.0078125, %v621_v7  ;;  %697 = vadd.xlane.f32.xlu1 %v678_v6  ;;  %v1502_v5 = vld [vmem:[%s1577_s5] ss:$0 sm:$0xff]  ;;  %s1149_s5 = smov [#allocation8]  }
 0x2b3   :  { %v1443_v9 = vsub.f32 %v1366_v0, %v648_v24  ;;  %v679_v10 = vmul.f32 %v1440_v8, %v1440_v8 }
 0x2b5   :  { %699 = vadd.xlane.f32.xlu0 %v679_v10  ;;  %v680_v25 = vmul.f32 %v1443_v9, %v1443_v9  ;;  %v1508_v10 = vld [vmem:[%s1578_s6] ss:$0 sm:$0xff]  ;;  %s854_s6 = sshll.u32 %s1149_s5, 4  ;;  %s855_s6 = int_to_ptr.vmem [resolvable:$true] %s854_s6 }
 0x2b6   :  { %v623_v11 = vpop.xlane.xlu0 %622  ;;  %s1113_s23 = scalar_lea.vmem %s855_s6, 2048  ;;  %p1118_p11 = scmp.lt.s32.totalorder %s855_s6, %s855_s6 }
 0x2b7   :  { %v649_v12 = vmul.f32 0.0078125, %v623_v11  ;;  %701 = vadd.xlane.f32.xlu1 %v680_v25  ;;  %p1114_p10 = scmp.ne.s32.totalorder %s855_s6, %s1113_s23  ;;  %p1119_p12 = scmp.lt.s32.totalorder %s1113_s23, %s1113_s23 }
 0x2b8   :  { %v625_v13 = vpop.xlane.xlu1 %624 }
 0x2b9   :  { %v1450_v14 = vsub.f32 %v1372_v34, %v649_v12  ;;  %v650_v31 = vmul.f32 0.0078125, %v625_v13  ;;  %p1120_p13 = por %p1119_p12, %p1118_p11 }
 0x2bb   :  { %v1453_v15 = vsub.f32 %v1376_v35, %v650_v31  ;;  %v681_v0 = vmul.f32 %v1450_v14, %v1450_v14  ;;  %p1121_p0 = pnand %p1120_p13, %p1114_p10 }
 0x2bd   :  { %703 = vadd.xlane.f32.xlu0 %v681_v0  ;;  %v682_v16 = vmul.f32 %v1453_v15, %v1453_v15 }
 0x2be   :  { %v627_v17 = vpop.xlane.xlu0 %626 }
 0x2bf   :  { %v651_v18 = vmul.f32 0.0078125, %v627_v17  ;;  %705 = vadd.xlane.f32.xlu1 %v682_v16 }
 0x2c0   :  { %v629_v19 = vpop.xlane.xlu1 %628 }
 0x2c1   :  { %v1460_v20 = vsub.f32 %v1382_v37, %v651_v18  ;;  %v652_v34 = vmul.f32 0.0078125, %v629_v19 }
 0x2c3   :  { %v1463_v22 = vsub.f32 %v1386_v38, %v652_v34  ;;  %v683_v35 = vmul.f32 %v1460_v20, %v1460_v20 }
 0x2c5   :  { %707 = vadd.xlane.f32.xlu0 %v683_v35  ;;  %v684_v62 = vmul.f32 %v1463_v22, %v1463_v22 }
 0x2c6   :  { %v631_v23 = vpop.xlane.xlu0 %630 }
 0x2c7   :  { %v653_v26 = vmul.f32 0.0078125, %v631_v23  ;;  %709 = vadd.xlane.f32.xlu1 %v684_v62 }
 0x2c8   :  { %v633_v63 = vpop.xlane.xlu1 %632 }
 0x2c9   :  { %v1470_v27 = vsub.f32 %v1392_v40, %v653_v26  ;;  %v654_v37 = vmul.f32 0.0078125, %v633_v63 }
 0x2cb   :  { %v1473_v28 = vsub.f32 %v1396_v41, %v654_v37  ;;  %v685_v38 = vmul.f32 %v1470_v27, %v1470_v27 }
 0x2cd   :  { %711 = vadd.xlane.f32.xlu0 %v685_v38  ;;  %v686_v30 = vmul.f32 %v1473_v28, %v1473_v28 }
 0x2ce   :  { %v635_v33 = vpop.xlane.xlu0 %634 }
 0x2cf   :  { %v655_v36 = vmul.f32 0.0078125, %v635_v33  ;;  %713 = vadd.xlane.f32.xlu1 %v686_v30 }
 0x2d0   :  { %v637_v39 = vpop.xlane.xlu1 %636 }
 0x2d1   :  { %v1480_v45 = vsub.f32 %v1402_v43, %v655_v36  ;;  %v656_v40 = vmul.f32 0.0078125, %v637_v39 }
 0x2d3   :  { %v1483_v48 = vsub.f32 %v1406_v44, %v656_v40  ;;  %v687_v41 = vmul.f32 %v1480_v45, %v1480_v45 }
 0x2d5   :  { %715 = vadd.xlane.f32.xlu0 %v687_v41  ;;  %v688_v51 = vmul.f32 %v1483_v48, %v1483_v48 }
 0x2d6   :  { %v639_v52 = vpop.xlane.xlu0 %638 }
 0x2d7   :  { %v657_v53 = vmul.f32 0.0078125, %v639_v52  ;;  %717 = vadd.xlane.f32.xlu1 %v688_v51 }
 0x2d8   :  { %v641_v54 = vpop.xlane.xlu1 %640 }
 0x2d9   :  { %v1490_v55 = vsub.f32 %v1412_v46, %v657_v53  ;;  %v658_v43 = vmul.f32 0.0078125, %v641_v54 }
 0x2db   :  { %v1493_v47 = vsub.f32 %v1416_v56, %v658_v43  ;;  %v689_v44 = vmul.f32 %v1490_v55, %v1490_v55 }
 0x2dd   :  { %719 = vadd.xlane.f32.xlu0 %v689_v44  ;;  %v690_v57 = vmul.f32 %v1493_v47, %v1493_v47 }
 0x2df   :  { %721 = vadd.xlane.f32.xlu1 %v690_v57 }
 0x332   :  { %v692_v59 = vpop.xlane.xlu0 %691 }
 0x333   :  { %v723_v60 = vmul.f32 0.0078125, %v692_v59 }
 0x335   :  { %v739_v21 = vadd.f32 1e-05, %v723_v60 }
 0x336   :  { %v694_v61 = vpop.xlane.xlu1 %693 }
 0x337   :  { %1015 = vrsqrt.f32 %v739_v21  ;;  %v724_v1 = vmul.f32 0.0078125, %v694_v61 }
 0x339   :  { %v740_v46 = vadd.f32 1e-05, %v724_v1 }
 0x33a   :  { %v696_v50 = vpop.xlane.xlu0 %695 }
 0x33b   :  { %1017 = vrsqrt.f32 %v740_v46  ;;  %v725_v29 = vmul.f32 0.0078125, %v696_v50 }
 0x33d   :  { %v741_v56 = vadd.f32 1e-05, %v725_v29 }
 0x33e   :  { %v698_v2 = vpop.xlane.xlu1 %697 }
 0x33f   :  { %1019 = vrsqrt.f32 %v741_v56  ;;  %v726_v3 = vmul.f32 0.0078125, %v698_v2 }
 0x341   :  { %v1016_v42 = vpop.eup %1015  ;;  %v742_v6 = vadd.f32 1e-05, %v726_v3 }
 0x342   :  { %v771_v7 = vmul.f32 %v1016_v42, %v1420_v58  ;;  %v700_v24 = vpop.xlane.xlu0 %699 }
 0x343   :  { %1021 = vrsqrt.f32 %v742_v6  ;;  %v727_v25 = vmul.f32 0.0078125, %v700_v24 }
 0x344   :  { %v794_v11 = vmul.f32 %v1502_v5, %v771_v7  ;;  %v702_v12 = vpop.xlane.xlu1 %701 }
 0x345   :  { %v1018_v13 = vpop.eup %1017  ;;  %v743_v31 = vadd.f32 1e-05, %v727_v25  ;;  %v728_v0 = vmul.f32 0.0078125, %v702_v12 }
 0x346   :  { %v817_v16 = vadd.f32 %v1508_v10, %v794_v11  ;;  %v772_v17 = vmul.f32 %v1018_v13, %v1425_v49 }
 0x347   :  { %1023 = vrsqrt.f32 %v743_v31  ;;  %v744_v58 = vadd.f32 1e-05, %v728_v0 }
 0x348   :  { %833 = vst [vmem:[#allocation8] sm:$0xff] %v817_v16  ;;  %v795_v18 = vmul.f32 %v1502_v5, %v772_v17 }
 0x349   :  { %v1020_v19 = vpop.eup %1019  ;;  %1025 = vrsqrt.f32 %v744_v58 }
 0x34a   :  { %v818_v34 = vadd.f32 %v1508_v10, %v795_v18  ;;  %v773_v35 = vmul.f32 %v1020_v19, %v1430_v32  ;;  %v704_v62 = vpop.xlane.xlu0 %703 }
 0x34b   :  { %v729_v23 = vmul.f32 0.0078125, %v704_v62 }
 0x34c   :  { %834 = vst [vmem:[#allocation8 + $0x8] sm:$0xff] %v818_v34  ;;  %v796_v26 = vmul.f32 %v1502_v5, %v773_v35  ;;  %v706_v63 = vpop.xlane.xlu1 %705 }
 0x34d   :  { %v1022_v37 = vpop.eup %1021  ;;  %v745_v38 = vadd.f32 1e-05, %v729_v23  ;;  %v730_v49 = vmul.f32 0.0078125, %v706_v63 }
 0x34e   :  { %v819_v30 = vadd.f32 %v1508_v10, %v796_v26  ;;  %v774_v33 = vmul.f32 %v1022_v37, %v1435_v4 }
 0x34f   :  { %1027 = vrsqrt.f32 %v745_v38  ;;  %v746_v36 = vadd.f32 1e-05, %v730_v49 }
 0x350   :  { %835 = vst [vmem:[#allocation8 + $0x10] sm:$0xff] %v819_v30  ;;  %v797_v39 = vmul.f32 %v1502_v5, %v774_v33 }
 0x351   :  { %v1024_v40 = vpop.eup %1023  ;;  %1029 = vrsqrt.f32 %v746_v36 }
 0x352   :  { %v820_v32 = vadd.f32 %v1508_v10, %v797_v39  ;;  %v775_v41 = vmul.f32 %v1024_v40, %v1440_v8  ;;  %v708_v51 = vpop.xlane.xlu0 %707 }
 0x353   :  { %v1026_v52 = vpop.eup %1025  ;;  %v731_v53 = vmul.f32 0.0078125, %v708_v51 }
 0x354   :  { %836 = vst [vmem:[#allocation8 + $0x18] sm:$0xff] %v820_v32  ;;  %v798_v54 = vmul.f32 %v1502_v5, %v775_v41  ;;  %v776_v43 = vmul.f32 %v1026_v52, %v1443_v9  ;;  %v710_v4 = vpop.xlane.xlu1 %709 }
 0x355   :  { %v747_v44 = vadd.f32 1e-05, %v731_v53  ;;  %v732_v57 = vmul.f32 0.0078125, %v710_v4 }
 0x356   :  { %v821_v59 = vadd.f32 %v1508_v10, %v798_v54  ;;  %v799_v60 = vmul.f32 %v1502_v5, %v776_v43 }
 0x357   :  { %1031 = vrsqrt.f32 %v747_v44  ;;  %v748_v21 = vadd.f32 1e-05, %v732_v57 }
 0x358   :  { %837 = vst [vmem:[#allocation8 + $0x20] sm:$0xff] %v821_v59  ;;  %v822_v8 = vadd.f32 %v1508_v10, %v799_v60 }
 0x359   :  { %v1028_v61 = vpop.eup %1027  ;;  %1033 = vrsqrt.f32 %v748_v21 }
 0x35a   :  { %838 = vst [vmem:[#allocation8 + $0x28] sm:$0xff] %v822_v8  ;;  %v777_v1 = vmul.f32 %v1028_v61, %v1450_v14  ;;  %v712_v46 = vpop.xlane.xlu0 %711 }
 0x35b   :  { %v1030_v50 = vpop.eup %1029  ;;  %v733_v9 = vmul.f32 0.0078125, %v712_v46 }
 0x35c   :  { %v800_v29 = vmul.f32 %v1502_v5, %v777_v1  ;;  %v778_v56 = vmul.f32 %v1030_v50, %v1453_v15  ;;  %v714_v2 = vpop.xlane.xlu1 %713 }
 0x35d   :  { %v749_v3 = vadd.f32 1e-05, %v733_v9  ;;  %v734_v42 = vmul.f32 0.0078125, %v714_v2 }
 0x35e   :  { %v823_v6 = vadd.f32 %v1508_v10, %v800_v29  ;;  %v801_v7 = vmul.f32 %v1502_v5, %v778_v56 }
 0x35f   :  { %1035 = vrsqrt.f32 %v749_v3  ;;  %v750_v24 = vadd.f32 1e-05, %v734_v42 }
 0x360   :  { %839 = vst [vmem:[#allocation8 + $0x30] sm:$0xff] %v823_v6  ;;  %v824_v25 = vadd.f32 %v1508_v10, %v801_v7 }
 0x361   :  { %v1032_v14 = vpop.eup %1031  ;;  %1037 = vrsqrt.f32 %v750_v24 }
 0x362   :  { %840 = vst [vmem:[#allocation8 + $0x38] sm:$0xff] %v824_v25  ;;  %v779_v11 = vmul.f32 %v1032_v14, %v1460_v20  ;;  %v716_v12 = vpop.xlane.xlu0 %715 }
 0x363   :  { %v1034_v13 = vpop.eup %1033  ;;  %v735_v15 = vmul.f32 0.0078125, %v716_v12 }
 0x364   :  { %v802_v31 = vmul.f32 %v1502_v5, %v779_v11  ;;  %v780_v0 = vmul.f32 %v1034_v13, %v1463_v22  ;;  %v718_v16 = vpop.xlane.xlu1 %717 }
 0x365   :  { %v751_v17 = vadd.f32 1e-05, %v735_v15  ;;  %v736_v58 = vmul.f32 0.0078125, %v718_v16 }
 0x366   :  { %v825_v18 = vadd.f32 %v1508_v10, %v802_v31  ;;  %v803_v19 = vmul.f32 %v1502_v5, %v780_v0 }
 0x367   :  { %1039 = vrsqrt.f32 %v751_v17  ;;  %v752_v34 = vadd.f32 1e-05, %v736_v58 }
 0x368   :  { %841 = vst [vmem:[#allocation8 + $0x40] sm:$0xff] %v825_v18  ;;  %v826_v35 = vadd.f32 %v1508_v10, %v803_v19 }
 0x369   :  { %v1036_v20 = vpop.eup %1035  ;;  %1041 = vrsqrt.f32 %v752_v34 }
 0x36a   :  { %842 = vst [vmem:[#allocation8 + $0x48] sm:$0xff] %v826_v35  ;;  %v781_v62 = vmul.f32 %v1036_v20, %v1470_v27  ;;  %v720_v23 = vpop.xlane.xlu0 %719 }
 0x36b   :  { %v1038_v26 = vpop.eup %1037  ;;  %v737_v22 = vmul.f32 0.0078125, %v720_v23 }
 0x36c   :  { %v804_v63 = vmul.f32 %v1502_v5, %v781_v62  ;;  %v782_v37 = vmul.f32 %v1038_v26, %v1473_v28  ;;  %v722_v38 = vpop.xlane.xlu1 %721 }
 0x36d   :  { %v753_v49 = vadd.f32 1e-05, %v737_v22  ;;  %v738_v30 = vmul.f32 0.0078125, %v722_v38 }
 0x36e   :  { %v827_v33 = vadd.f32 %v1508_v10, %v804_v63  ;;  %v805_v36 = vmul.f32 %v1502_v5, %v782_v37 }
 0x36f   :  { %1043 = vrsqrt.f32 %v753_v49  ;;  %v754_v39 = vadd.f32 1e-05, %v738_v30 }
 0x370   :  { %843 = vst [vmem:[#allocation8 + $0x50] sm:$0xff] %v827_v33  ;;  %v828_v40 = vadd.f32 %v1508_v10, %v805_v36 }
 0x371   :  { %v1040_v27 = vpop.eup %1039  ;;  %1045 = vrsqrt.f32 %v754_v39 }
 0x372   :  { %844 = vst [vmem:[#allocation8 + $0x58] sm:$0xff] %v828_v40  ;;  %v783_v32 = vmul.f32 %v1040_v27, %v1480_v45 }
 0x373   :  { %v1042_v41 = vpop.eup %1041 }
 0x374   :  { %v806_v28 = vmul.f32 %v1502_v5, %v783_v32  ;;  %v784_v51 = vmul.f32 %v1042_v41, %v1483_v48 }
 0x376   :  { %v829_v52 = vadd.f32 %v1508_v10, %v806_v28  ;;  %v807_v53 = vmul.f32 %v1502_v5, %v784_v51 }
 0x378   :  { %845 = vst [vmem:[#allocation8 + $0x60] sm:$0xff] %v829_v52  ;;  %v830_v54 = vadd.f32 %v1508_v10, %v807_v53 }
 0x379   :  { %v1044_v43 = vpop.eup %1043 }
 0x37a   :  { %846 = vst [vmem:[#allocation8 + $0x68] sm:$0xff] %v830_v54  ;;  %v785_v4 = vmul.f32 %v1044_v43, %v1490_v55 }
 0x37b   :  { %v1046_v44 = vpop.eup %1045 }
 0x37c   :  { %v808_v57 = vmul.f32 %v1502_v5, %v785_v4  ;;  %v786_v45 = vmul.f32 %v1046_v44, %v1493_v47 }
 0x37e   :  { %v831_v48 = vadd.f32 %v1508_v10, %v808_v57  ;;  %v809_v59 = vmul.f32 %v1502_v5, %v786_v45 }
 0x380   :  { %847 = vst [vmem:[#allocation8 + $0x70] sm:$0xff] %v831_v48  ;;  %v832_v60 = vadd.f32 %v1508_v10, %v809_v59 }
 0x382   :  { %848 = vst [vmem:[#allocation8 + $0x78] sm:$0xff] %v832_v60 }
 0x383   :  { %1124 = shalt.err (!%p1121_p0)
}
 0x384   :  { %s1125_s25 = scalar_lea.hbm %s1579_s7, 2048 }
 0x385   :  { %p1126_p1 = scmp.ne.s32.totalorder %s1579_s7, %s1125_s25  ;;  %p1129_p2 = scmp.lt.u32.totalorder %s1125_s25, %s1579_s7 }
 0x387   :  { %p1131_p3 = pnand %p1129_p2, %p1126_p1 }
 0x389   :  { %1134 = shalt.err (!%p1131_p3)
}
 0x38a   :  { %860 = dma.vmem_to_hbm [thread:$0]  %s855_s6, 2048, %s1579_s7, [#allocation4], %s1143_s13, %s1143_s13, %s1144_s14  }
 0x38b   :  { %1139 = dma.done.wait [#allocation4], 2048  }
 0x38c   :  { %1140 = vsyncadd [#allocation4], 4294965248 }
 0x38d   :  { %864 = vsyncpa [#allocation3], 1 }
 0x38e   :  { %865 = vsyncpa [#allocation6], 1 }
 0x38f   :  { %866 = vsyncpa [#allocation4], 1 }

</bundles_post_ra>
